<compile_context>
chip_gen: v6e
topology: v6e:2x2x1
jax: 0.10.0
libtpu: 0.0.40
codegen_flags: <defaults>
</compile_context>

<pallas_src>
import functools
import math

import jax
import jax.numpy as jnp
from jax import lax
from jax.experimental import pallas as pl
from jax.experimental.pallas import tpu as pltpu


# -----------------------------------------------------------------------------
# Kernel 1: 1x1 conv (matmul) + bmm + softmax over tokens + sentence aggregation
#           with the [img_embed || sentence] concat fused into the output.
# -----------------------------------------------------------------------------
def _attn_kernel(inv_T, C_txt, img_ref, w_ref, txt_ref, x_ref, att_ref):
    img = img_ref[0].astype(jnp.bfloat16)       # (HW, C_img)
    w = w_ref[...]                              # (C_img, C_txt) bf16
    txt = txt_ref[0].astype(jnp.bfloat16)       # (L, C_txt)

    # img1x1conv: 1x1 conv == per-pixel matmul (bf16 MXU, f32 accumulation)
    emb = jnp.dot(img, w, preferred_element_type=jnp.float32)      # (HW, C_txt)
    emb_bf = emb.astype(jnp.bfloat16)

    # logits[l, i] = sum_c txt[l, c] * emb[i, c]   (no explicit transpose)
    logits = lax.dot_general(
        txt, emb_bf, (((1,), (1,)), ((), ())),
        preferred_element_type=jnp.float32) * inv_T                # (L, HW)

    # softmax over the text-token axis (torch dim=1), f32
    m = jnp.max(logits, axis=0, keepdims=True)
    e = jnp.exp(logits - m)
    denom = jnp.sum(e, axis=0, keepdims=True)
    att = e * pl.reciprocal(denom, approx=True)                    # (L, HW)

    # sentence[i, c] = sum_l att[l, i] * txt[l, c]  (contraction, no transpose)
    sent = lax.dot_general(
        att.astype(jnp.bfloat16), txt, (((0,), (0,)), ((), ())),
        preferred_element_type=jnp.float32)                        # (HW, C_txt)

    # fused concat: x = [img_embed || sentence] along channels, stored bf16
    x_ref[0, :, :C_txt] = emb.astype(x_ref.dtype)
    x_ref[0, :, C_txt:] = sent.astype(x_ref.dtype)
    att_ref[0] = att.astype(att_ref.dtype)


def _attention_stage(img_flat, w_1x1_bf16, text_embed, inv_T):
    n, HW, C_img = img_flat.shape
    _, L, C_txt = text_embed.shape
    kernel = functools.partial(_attn_kernel, inv_T, C_txt)
    return pl.pallas_call(
        kernel,
        out_shape=(
            jax.ShapeDtypeStruct((n, HW, C_img), jnp.bfloat16),   # x = [emb|sent]
            jax.ShapeDtypeStruct((n, L, HW), jnp.float32),        # attention
        ),
        grid=(n,),
        in_specs=[
            pl.BlockSpec((1, HW, C_img), lambda b: (b, 0, 0)),
            pl.BlockSpec((C_img, C_txt), lambda b: (0, 0)),       # resident weight
            pl.BlockSpec((1, L, C_txt), lambda b: (b, 0, 0)),
        ],
        out_specs=(
            pl.BlockSpec((1, HW, C_img), lambda b: (b, 0, 0)),
            pl.BlockSpec((1, L, HW), lambda b: (b, 0, 0)),
        ),
        compiler_params=pltpu.CompilerParams(
            dimension_semantics=("parallel",),
            vmem_limit_bytes=64 * 1024 * 1024),
    )(img_flat, w_1x1_bf16, text_embed)


# -----------------------------------------------------------------------------
# Kernel 2: Inception2d (gamma & beta) + elementwise modulation gamma*img + beta
#
# The padded activation is passed as a single flat (P, C) slab per batch
# element (P = (H+3)*(W+2)); every 3x3 tap is a *contiguous* slice of that
# slab in "wide" (width = W+2) flattened coordinates, so no per-tap HBM
# materialization and no in-kernel reshapes of tiled dims are needed.  The
# two extra columns per row are garbage and dropped by the wrapper.
# -----------------------------------------------------------------------------
def _inception_mod_kernel(H, W, Ch, xp_ref, img_ref,
                          gw1_ref, gw3_ref, bw1_ref, bw3_ref, out_ref):
    Wp = W + 2
    Mw = H * Wp
    img = img_ref[0]                                  # (Mw, C) f32 (wide layout)

    # ---- branch 1 (1x1 conv) -> output channels [0, Ch) -----------------
    xc = xp_ref[0, pl.ds(Wp + 1, Mw), :]              # center tap, (Mw, C) bf16
    g1 = jnp.dot(xc, gw1_ref[...], preferred_element_type=jnp.float32)
    b1 = jnp.dot(xc, bw1_ref[...], preferred_element_type=jnp.float32)
    out_ref[0, :, :Ch] = (g1 * img[:, :Ch] + b1).astype(out_ref.dtype)

    # ---- branch 2 (3x3 conv, pad=1) -> output channels [Ch, 2*Ch) -------
    g3 = jnp.zeros((Mw, Ch), jnp.float32)
    b3 = jnp.zeros((Mw, Ch), jnp.float32)
    for k in range(9):
        kh, kw = k // 3, k % 3
        tap = xp_ref[0, pl.ds(kh * Wp + kw, Mw), :]   # contiguous shifted slice
        g3 = g3 + jnp.dot(tap, gw3_ref[k], preferred_element_type=jnp.float32)
        b3 = b3 + jnp.dot(tap, bw3_ref[k], preferred_element_type=jnp.float32)
    out_ref[0, :, Ch:] = (g3 * img[:, Ch:] + b3).astype(out_ref.dtype)


def _inception_mod_stage(xp, img_wide, H, W, gw1, gw3, bw1, bw3):
    n, P, C = xp.shape
    Ch = C // 2
    Mw = img_wide.shape[1]
    kernel = functools.partial(_inception_mod_kernel, H, W, Ch)
    return pl.pallas_call(
        kernel,
        out_shape=jax.ShapeDtypeStruct((n, Mw, C), jnp.float32),
        grid=(n,),
        in_specs=[
            pl.BlockSpec((1, P, C), lambda b: (b, 0, 0)),
            pl.BlockSpec((1, Mw, C), lambda b: (b, 0, 0)),
            # weights: constant index_map -> fetched once, resident across batch
            pl.BlockSpec((C, Ch), lambda b: (0, 0)),
            pl.BlockSpec((9, C, Ch), lambda b: (0, 0, 0)),
            pl.BlockSpec((C, Ch), lambda b: (0, 0)),
            pl.BlockSpec((9, C, Ch), lambda b: (0, 0, 0)),
        ],
        out_specs=pl.BlockSpec((1, Mw, C), lambda b: (b, 0, 0)),
        compiler_params=pltpu.CompilerParams(
            dimension_semantics=("parallel",),
            vmem_limit_bytes=64 * 1024 * 1024),
    )(xp, img_wide, gw1, gw3, bw1, bw3)


# -----------------------------------------------------------------------------
# Wrapper (layout plumbing only: transposes, single pad, final crop)
# -----------------------------------------------------------------------------
def local_conv_forward(params, img_tensor, text_embed, T=7.0):
    n, C_img, H, W = img_tensor.shape
    HW = H * W
    C_txt = text_embed.shape[-1]
    Wp = W + 2
    P = (H + 3) * Wp          # padded flat length (one spare row for tap overrun)
    Mw = H * Wp               # "wide" output length (extra 2 garbage cols / row)

    img_nhwc = jnp.transpose(img_tensor, (0, 2, 3, 1))        # (N, H, W, C)
    img_flat = img_nhwc.reshape(n, HW, C_img)                 # (N, HW, C)

    # ---- stage 1: attention + fused [emb || sentence] concat (bf16 x) ----
    x, atten = _attention_stage(
        img_flat, params["w_1x1"].astype(jnp.bfloat16), text_embed, 1.0 / T)

    # Single pad of x (no 9x im2col): (N, H+3, W+2, C) -> flat (N, P, C), bf16
    xp = jnp.pad(x.reshape(n, H, W, C_img),
                 ((0, 0), (1, 2), (1, 1), (0, 0))).reshape(n, P, C_img)

    # img in "wide" layout (right-padded 2 cols) for in-kernel modulation, f32
    img_wide = jnp.pad(img_nhwc, ((0, 0), (0, 0), (0, 2), (0, 0))
                       ).reshape(n, Mw, C_img)

    # ---- stage 2: inception gamma/beta + modulation -----------------------
    out_wide = _inception_mod_stage(
        xp, img_wide, H, W,
        params["gamma_w1"].astype(jnp.bfloat16),
        params["gamma_w3"].astype(jnp.bfloat16),
        params["beta_w1"].astype(jnp.bfloat16),
        params["beta_w3"].astype(jnp.bfloat16))

    out = out_wide.reshape(n, H, Wp, C_img)[:, :, :W, :]      # drop garbage cols
    out = jnp.transpose(out, (0, 3, 1, 2))                    # back to NCHW
    return out, atten


def init_params(key, img_channel, text_dim):
    assert img_channel == 2 * text_dim, \
        "cat([img_embed, sentence]) must give img_channel"
    Ch = img_channel // 2
    k = jax.random.split(key, 5)
    s_img = 1.0 / math.sqrt(img_channel)
    s_3x3 = 1.0 / math.sqrt(9 * img_channel)
    return {
        # torch Conv2d(C_img -> C_txt, k=1, bias=False) weight, stored (C_in, C_out)
        "w_1x1": jax.random.normal(k[0], (img_channel, text_dim), jnp.float32) * s_img,
        # Inception gamma branch weights
        "gamma_w1": jax.random.normal(k[1], (img_channel, Ch), jnp.float32) * s_img,
        "gamma_w3": jax.random.normal(k[2], (9, img_channel, Ch), jnp.float32) * s_3x3,
        # Inception beta branch weights
        "beta_w1": jax.random.normal(k[3], (img_channel, Ch), jnp.float32) * s_img,
        "beta_w3": jax.random.normal(k[4], (9, img_channel, Ch), jnp.float32) * s_3x3,
    }


if __name__ == "__main__":
    # Small shapes consistent with the module (module defaults are 2048/1024;
    # scaled down keeping img_channel == 2 * text_dim).
    N, C_IMG, C_TXT, H, W, L = 2, 32, 16, 4, 4, 8
    T = 7.0

    key = jax.random.PRNGKey(0)
    kp, ki, kt = jax.random.split(key, 3)
    params = init_params(kp, C_IMG, C_TXT)

    img_tensor = jax.random.normal(ki, (N, C_IMG, H, W), jnp.float32)
    text_embed = jax.random.normal(kt, (N, L, C_TXT), jnp.float32)

    out, atten = local_conv_forward(params, img_tensor, text_embed, T)
    out = jax.block_until_ready(out)
    atten = jax.block_until_ready(atten)

    assert out.shape == (N, C_IMG, H, W)
    assert atten.shape == (N, L, H * W)
    print("KERNEL_OK")
</pallas_src>

<mosaic_0001>
module attributes {stable_mosaic.version = 11 : i64} {
  func.func @_attn_kernel(%arg0: i32, %arg1: memref<1x16x32xf32, #tpu.memory_space<vmem>>, %arg2: memref<32x16xbf16, #tpu.memory_space<vmem>>, %arg3: memref<1x8x16xf32, #tpu.memory_space<vmem>>, %arg4: memref<1x16x32xbf16, #tpu.memory_space<vmem>>, %arg5: memref<1x8x16xf32, #tpu.memory_space<vmem>>) attributes {dimension_semantics = [#tpu.dimension_semantics<parallel>], iteration_bounds = array<i64: 2>, scalar_prefetch = 0 : i64, scratch_operands = 0 : i64, tpu.core_type = #tpu.core_type<tc>, window_params = [{transform_indices = @transform_0, window_bounds = array<i64: 1, 16, 32>}, {pipeline_mode = #tpu.pipeline_mode<synchronous>, transform_indices = @transform_1, window_bounds = array<i64: 32, 16>}, {transform_indices = @transform_2, window_bounds = array<i64: 1, 8, 16>}, {transform_indices = @transform_3, window_bounds = array<i64: 1, 16, 32>}, {transform_indices = @transform_4, window_bounds = array<i64: 1, 8, 16>}]} {
    %c0 = arith.constant 0 : index
    %c0_0 = arith.constant 0 : index
    %c0_1 = arith.constant 0 : index
    %0 = vector.load %arg1[%c0, %c0_0, %c0_1] : memref<1x16x32xf32, #tpu.memory_space<vmem>>, vector<1x16x32xf32>
    %1 = vector.shape_cast %0 : vector<1x16x32xf32> to vector<16x32xf32>
    %2 = arith.truncf %1 : vector<16x32xf32> to vector<16x32xbf16>
    %c0_2 = arith.constant 0 : index
    %c0_3 = arith.constant 0 : index
    %3 = vector.load %arg2[%c0_2, %c0_3] : memref<32x16xbf16, #tpu.memory_space<vmem>>, vector<32x16xbf16>
    %c0_4 = arith.constant 0 : index
    %c0_5 = arith.constant 0 : index
    %c0_6 = arith.constant 0 : index
    %4 = vector.load %arg3[%c0_4, %c0_5, %c0_6] : memref<1x8x16xf32, #tpu.memory_space<vmem>>, vector<1x8x16xf32>
    %5 = vector.shape_cast %4 : vector<1x8x16xf32> to vector<8x16xf32>
    %6 = arith.truncf %5 : vector<8x16xf32> to vector<8x16xbf16>
    %cst = arith.constant dense<0.000000e+00> : vector<16x16xf32>
    %7 = tpu.matmul %2, %3, %cst {dimension_numbers = #tpu.dot_dimension_numbers<[1], [0], [0], [1], [0, 0, 1, 1], [], []>} : vector<16x32xbf16>, vector<32x16xbf16>, vector<16x16xf32> -> vector<16x16xf32>
    %8 = arith.truncf %7 : vector<16x16xf32> to vector<16x16xbf16>
    %cst_7 = arith.constant dense<0.000000e+00> : vector<8x16xf32>
    %9 = tpu.matmul %6, %8, %cst_7 {dimension_numbers = #tpu.dot_dimension_numbers<[1], [1], [0], [0], [0, 0, 1, 0], [], []>} : vector<8x16xbf16>, vector<16x16xbf16>, vector<8x16xf32> -> vector<8x16xf32>
    %cst_8 = arith.constant 0.142857149 : f32
    %10 = vector.broadcast %cst_8 : f32 to vector<8x16xf32>
    %11 = arith.mulf %9, %10 : vector<8x16xf32>
    %cst_9 = arith.constant dense<0xFF800000> : vector<16xf32>
    %12 = vector.multi_reduction <maximumf>, %11, %cst_9 [0] : vector<8x16xf32> to vector<16xf32>
    %13 = vector.shape_cast %12 : vector<16xf32> to vector<1x16xf32>
    %14 = vector.broadcast %13 : vector<1x16xf32> to vector<8x16xf32>
    %15 = arith.subf %11, %14 : vector<8x16xf32>
    %16 = math.exp %15 : vector<8x16xf32>
    %cst_10 = arith.constant dense<0.000000e+00> : vector<16xf32>
    %17 = vector.multi_reduction <add>, %16, %cst_10 [0] : vector<8x16xf32> to vector<16xf32>
    %18 = vector.shape_cast %17 : vector<16xf32> to vector<1x16xf32>
    %19 = tpu.reciprocal %18 {approx = true} : vector<1x16xf32> -> vector<1x16xf32>
    %20 = vector.broadcast %19 : vector<1x16xf32> to vector<8x16xf32>
    %21 = arith.mulf %16, %20 : vector<8x16xf32>
    %22 = arith.truncf %21 : vector<8x16xf32> to vector<8x16xbf16>
    %cst_11 = arith.constant dense<0.000000e+00> : vector<16x16xf32>
    %23 = tpu.matmul %22, %6, %cst_11 {dimension_numbers = #tpu.dot_dimension_numbers<[0], [0], [1], [1], [0, 1, 1, 1], [], []>} : vector<8x16xbf16>, vector<8x16xbf16>, vector<16x16xf32> -> vector<16x16xf32>
    %24 = arith.truncf %7 : vector<16x16xf32> to vector<16x16xbf16>
    %c0_12 = arith.constant 0 : index
    %c0_13 = arith.constant 0 : index
    %c0_14 = arith.constant 0 : index
    %25 = vector.load %arg4[%c0_12, %c0_13, %c0_14] : memref<1x16x32xbf16, #tpu.memory_space<vmem>>, vector<1x16x16xbf16>
    %26 = vector.shape_cast %25 : vector<1x16x16xbf16> to vector<16x16xbf16>
    %27 = vector.shape_cast %24 : vector<16x16xbf16> to vector<1x16x16xbf16>
    tpu.vector_store %arg4[%c0_12, %c0_13, %c0_14], %27 {strides = array<i32>} : memref<1x16x32xbf16, #tpu.memory_space<vmem>>, vector<1x16x16xbf16>,
    %28 = arith.truncf %23 : vector<16x16xf32> to vector<16x16xbf16>
    %c0_15 = arith.constant 0 : index
    %c0_16 = arith.constant 0 : index
    %c16 = arith.constant 16 : index
    %29 = vector.load %arg4[%c0_15, %c0_16, %c16] : memref<1x16x32xbf16, #tpu.memory_space<vmem>>, vector<1x16x16xbf16>
    %30 = vector.shape_cast %29 : vector<1x16x16xbf16> to vector<16x16xbf16>
    %31 = vector.shape_cast %28 : vector<16x16xbf16> to vector<1x16x16xbf16>
    tpu.vector_store %arg4[%c0_15, %c0_16, %c16], %31 {strides = array<i32>} : memref<1x16x32xbf16, #tpu.memory_space<vmem>>, vector<1x16x16xbf16>,
    %c0_17 = arith.constant 0 : index
    %c0_18 = arith.constant 0 : index
    %c0_19 = arith.constant 0 : index
    %32 = vector.load %arg5[%c0_17, %c0_18, %c0_19] : memref<1x8x16xf32, #tpu.memory_space<vmem>>, vector<1x8x16xf32>
    %33 = vector.shape_cast %32 : vector<1x8x16xf32> to vector<8x16xf32>
    %34 = vector.shape_cast %21 : vector<8x16xf32> to vector<1x8x16xf32>
    tpu.vector_store %arg5[%c0_17, %c0_18, %c0_19], %34 {strides = array<i32>} : memref<1x8x16xf32, #tpu.memory_space<vmem>>, vector<1x8x16xf32>,
    return
  }
  func.func @transform_0(%arg0: i32) -> (i32, i32, i32) {
    %c0_i32 = arith.constant 0 : i32
    %c0_i32_0 = arith.constant 0 : i32
    %c0_i32_1 = arith.constant 0 : i32
    return %arg0, %c0_i32, %c0_i32_0 : i32, i32, i32
  }
  func.func @transform_1(%arg0: i32) -> (i32, i32) {
    %c0_i32 = arith.constant 0 : i32
    %c0_i32_0 = arith.constant 0 : i32
    %c0_i32_1 = arith.constant 0 : i32
    return %c0_i32, %c0_i32_0 : i32, i32
  }
  func.func @transform_2(%arg0: i32) -> (i32, i32, i32) {
    %c0_i32 = arith.constant 0 : i32
    %c0_i32_0 = arith.constant 0 : i32
    %c0_i32_1 = arith.constant 0 : i32
    return %arg0, %c0_i32, %c0_i32_0 : i32, i32, i32
  }
  func.func @transform_3(%arg0: i32) -> (i32, i32, i32) {
    %c0_i32 = arith.constant 0 : i32
    %c0_i32_0 = arith.constant 0 : i32
    %c0_i32_1 = arith.constant 0 : i32
    return %arg0, %c0_i32, %c0_i32_0 : i32, i32, i32
  }
  func.func @transform_4(%arg0: i32) -> (i32, i32, i32) {
    %c0_i32 = arith.constant 0 : i32
    %c0_i32_0 = arith.constant 0 : i32
    %c0_i32_1 = arith.constant 0 : i32
    return %arg0, %c0_i32, %c0_i32_0 : i32, i32, i32
  }
}

</mosaic_0001>

<bundles_post_ra>
// kernel: tpu_custom_call.1
= control target key start
LH: loop header
LB: loop body
LE: loop exit
PB: predicated region body
PF: predicated region fallthrough
CT: control target
= control target key end

     0   :  { %10 = vsyncpa [#allocation3], 0  ;;  %s1105_s0 = inlined_call_operand.hbm [shape: f32[2,16,32], index: 0, kind: input, shape index: {}]   ;;  %s1106_s1 = inlined_call_operand.vmem [shape: bf16[32,16], index: 1, kind: input, shape index: {}]   ;;  %s1107_s2 = inlined_call_operand.vmem [shape: f32[2,8,16], index: 2, kind: input, shape index: {}]   ;;  %s1108_s3 = inlined_call_operand.hbm [shape: bf16[2,16,32], index: 3, kind: output, shape index: {0}]   ;;  %s1109_s4 = inlined_call_operand.hbm [shape: f32[2,8,16], index: 4, kind: output, shape index: {1}]  }
   0x1   :  { %12 = vsyncpa [#allocation3 + $0x1], 0 }
   0x2   :  { %13 = vsyncpa [#allocation4], 0 }
   0x3   :  { %15 = vsyncpa [#allocation4 + $0x1], 0 }
   0x4   :  { %16 = vsyncpa [#allocation7], 0 }
   0x5   :  { %18 = vsyncpa [#allocation7 + $0x1], 0  ;;  %s903_s15 = smov 0   ;;  %s905_s16 = smov 0  }
   0x6   :  { %s907_s17 = smov 0   ;;  %s909_s18 = smov 0  }
   0x7 LB: > { %s924_s19 = sadd.s32 4294967295, %s866_s18   ;;  %s619_s20 = sadd.s32 4294967294, %s866_s18   ;;  %s866_s18 = sphi %s909_s18, %s1124_s18   ;;  %s862_s17 = sphi %s907_s17, %s1123_s17   ;;  %s858_s16 = sphi %s905_s16, %s1122_s16   ;;  %s854_s15 = sphi %s903_s15, %s1121_s15  }
   0x8   : > { %s928_s21 = sadd.s32 1, %s866_s18   ;;  %s31_s22 = sadd.s32 1, %s862_s17 }
   0x9   : > { %s28_s23 = ssub.s32 %s866_s18, %s928_s21  ;;  %p38_p0 = scmp.ne.s32.totalorder %s862_s17, %s858_s16 }
   0xa   : > { %p29_p1 = scmp.eq.s32.totalorder %s28_s23, 0  ;;  %p39_p2 = scmp.eq.s32.totalorder %s866_s18, 0 }
   0xb   : > { %p44_p3 = scmp.ne.s32.totalorder %s858_s16, %s854_s15  ;;  %p45_p4 = scmp.eq.s32.totalorder %s924_s19, 0 }
   0xc   : > { %s940_s24 = scalar_select %p29_p1, %s862_s17, %s31_s22  }
   0xd   : > { %p942_p5 = por %p39_p2, %p38_p0  ;;  %p946_p6 = por %p45_p4, %p44_p3 }
   0xe   : > { %p115_p7 = scmp.eq.s32.totalorder %s924_s19, 1  ;;  %p121_p8 = scmp.eq.s32.totalorder %s619_s20, 1 }
   0xf   : > { %s1113_s26 = scalar_select %p946_p6, 1, 0 }
  0x10   : > { %p696_p10 = scmp.lt.s32.totalorder %s866_s18, 2  ;;  %p953_p11 = por %p115_p7, %p38_p0 }
  0x11   : > { %p957_p12 = por %p121_p8, %p44_p3  ;;  %s170_s29 = sand.u32 1, %s862_s17  }
  0x12   : > { %s1114_s27 = scalar_select %p953_p11, 1, 0 }
  0x13   : > { %s1115_s28 = scalar_select %p957_p12, 1, 0 }
  0x14   : > { %s646_s30 = sshll.u32 %s866_s18, 8  ;;  %s622_s5 = sshll.u32 %s170_s29, 4 }
  0x15   : > { %s966_s8 = scalar_lea.hbm %s1105_s0, %s646_s30  ;;  %s174_s9 = scalar_lea.vmem [#allocation2], %s622_s5 }
  0x16   : > { %s181_s10 = sshll.u32 %s174_s9, 4  ;;  %p970_p13 = pnand %p696_p10, %p942_p5  ;;  %s974_s10 = int_to_ptr.vmem [resolvable:$true] %s181_s10 }
  0x17   : > { %s976_s12 = scalar_lea.sflag [#allocation3], %s170_s29  ;;  %s744_s13 = scalar_lea.hbm %s966_s8, 256 }
  0x18   : > { %p745_p0 = scmp.ne.s32.totalorder %s966_s8, %s744_s13  ;;  %p746_p1 = pneg %p970_p13 }
  0x19   : > { %s749_s22 = scalar_lea.hbm %s1105_s0, 512  ;;  %p750_p4 = scmp.lt.s32.totalorder %s966_s8, %s1105_s0 }
  0x1a   : > { %p747_p2 = pnand %p746_p1, %p745_p0  ;;  %p751_p5 = scmp.lt.s32.totalorder %s749_s22, %s744_s13 }
  0x1c   : > { %p748_p3 = pneg %p747_p2  ;;  %p752_p7 = por %p751_p5, %p750_p4 }
  0x1e   : > { %p753_p8 = pnand %p752_p7, %p748_p3 }
  0x20   : > { %756 = shalt.err (!%p753_p8)
}
  0x21   : > { %s757_s29 = scalar_lea.vmem %s974_s10, 256  ;;  %s868_s30 = smov [#allocation2]  }
  0x22   : > { %p758_p10 = scmp.ne.s32.totalorder %s974_s10, %s757_s29  ;;  %s762_s5 = sshll.u32 %s868_s30, 4  ;;  %s763_s5 = int_to_ptr.vmem [resolvable:$false] %s762_s5 }
  0x23   : > { %s764_s6 = scalar_lea.vmem %s763_s5, 512  ;;  %p765_p2 = scmp.lt.s32.totalorder %s974_s10, %s763_s5 }
  0x24   : > { %p760_p9 = pnand %p758_p10, %p746_p1  ;;  %p766_p12 = scmp.lt.s32.totalorder %s764_s6, %s757_s29 }
  0x26   : > { %p761_p0 = pneg %p760_p9  ;;  %p767_p11 = por %p766_p12, %p765_p2 }
  0x28   : > { %p768_p6 = pnand %p767_p11, %p761_p0 }
  0x2a   : > { %771 = shalt.err (!%p768_p6)
}
  0x2b   : > { %s869_s7 = smov 128   ;;  %s870_s9 = smov 8  }
  0x2c   : > { %688 = dma.hbm_to_vmem [thread:$0]  (!%p970_p13), %s966_s8, 256, %s974_s10, %s976_s12, %s869_s7, %s869_s7, %s870_s9  }
  0x2d   : > { %p625_p9 = scmp.ge.s32.totalorder %s866_s18, 1  ;;  %p196_p1 = scmp.lt.s32.totalorder %s866_s18, 3 }
  0x2f   : > { %p197_p3 = pnand %p625_p9, %p196_p1 }
  0x30   : > { %s1000_s13 = sand.u32 (!%p197_p3), 1, %s858_s16   ;;  %p1117_p6 = scmp.ne.s32.totalorder (!%p197_p3), %s1113_s26, 0 }
  0x31   : > { %200 = sbr.rel (%p197_p3) target bundleno = 956 (0x3bc), region = 32  ;;  %s626_s14 = sshll.u32 (!%p197_p3), %s1000_s13, 4 }
  0x32   : > { %s203_s20 = scalar_lea.sflag (!%p197_p3), [#allocation3], %s1000_s13  ;;  %s206_s22 = scalar_lea.vmem (!%p197_p3), [#allocation2], %s626_s14 }
  0x36   : > { %841 = dma.done.wait (%p1117_p6), %s203_s20, 256  }
  0x37   : > { %843 = vsyncadd (%p1117_p6), %s203_s20, 4294967040  ;;  %v871_v0 = vmov 0.0   ;;  %vm872_vm0 = vmmov 0   ;;  %v738_v1 = vld [vmem:[%s1106_s1 + $0x8] sm:$0xff]   ;;  %v739_v2 = vld [vmem:[%s1106_s1] sm:$0xff]   ;;  %vm266_vm1 = vcmask 261120  }
  0x38   : > { %659 = vmatprep.subr.bf16.mxu0 %v871_v0  ;;  %663 = vmatprep.mubr.msk.bf16.mxu0 %vm872_vm0, %v871_v0  ;;  %v245_v3 = vld [vmem:[%s206_s22] sm:$0xff]  ;;  %v246_v4 = vld [vmem:[%s206_s22 + $0x8] sm:$0xff]  ;;  %p240_p11 = scmp.lt.s32.totalorder %s924_s19, 1  ;;  %s627_s26 = sshll.u32 %s1000_s13, 3  ;;  %vm451_vm2 = vcmask 125952   ;;  %vm312_vm3 = vcmask 130048  }
  0x39   : > { %667 = vmatprep.subr.bf16.mxu1 %v871_v0  ;;  %669 = vmatprep.mubr.msk.bf16.mxu1 %vm872_vm0, %v871_v0  ;;  %v247_v5 = vpack.c.bf16 %v246_v4, %v245_v3  ;;  %s1019_s29 = scalar_lea.vmem [#allocation5], %s627_s26  ;;  %vm400_vm4 = vcmask 1043456   ;;  %s239_s7 = scalar_lea.vmem [#allocation6], %s627_s26  ;;  %vm396_vm5 = vcmask 64512  }
  0x3a   : > { %660 = vmatpush3.bf16.msra.mxu0 %v738_v1  ;;  %s241_s23 = scalar_select %p240_p11, %s924_s19, 1 }
  0x3b   : > { %661 = vmatprep.subr.bf16.mxu0 %v871_v0  ;;  %s651_s9 = sshll.u32 %s924_s19, 7  ;;  %s505_s8 = sshll.u32 %s239_s7, 4  ;;  %s506_s8 = int_to_ptr.vmem [resolvable:$true] %s505_s8 }
  0x3c   : > { %s629_s25 = sshll.u32 %s241_s23, 3  ;;  %s503_s22 = scalar_lea.hbm %s1109_s4, %s651_s9 }
  0x3d   : > { %s243_s6 = scalar_lea.vmem %s1107_s2, %s629_s25  ;;  %s476_s10 = scalar_lea.sflag [#allocation7], %s1000_s13 }
  0x3e   : > { %662 = vmatpush3.bf16.msra.mxu0 %v739_v2  ;;  %v252_v14 = vld [vmem:[%s243_s6] sm:$0xff]  ;;  %s772_s11 = scalar_lea.vmem %s506_s8, 128  ;;  %p1118_p13 = scmp.ne.s32.totalorder %s1114_s27, 0 }
  0x3f   : > { %673 = vmatprep.subr.bf16.mxu0 %v871_v0  ;;  %v253_v15 = vpack.c.bf16 %v252_v14, %v252_v14  ;;  %p773_p12 = scmp.ne.s32.totalorder %s506_s8, %s772_s11  ;;  %s873_s12 = smov [#allocation6]  }
  0x40   : > { %s776_s26 = sshll.u32 %s873_s12, 4  ;;  %s777_s26 = int_to_ptr.vmem [resolvable:$false] %s776_s26 }
  0x41   : > { %664 = vmatmul.mubr.msk.bf16.vlgmr.msra.gmra.mxu0 %vm266_vm1, %v247_v5  ;;  %v401_v16 = vsel %vm400_vm4, %v253_v15, 0  ;;  %p774_p4 = pnand %p773_p12, %p1118_p13  ;;  %s778_s23 = scalar_lea.vmem %s777_s26, 256 }
  0x42   : > { %675 = vmatprep.mubr.msk.bf16.mxu0 %vm872_vm0, %v871_v0  ;;  %674 = vmatpush3.bf16.msra.mxu0 %v401_v16  ;;  %p779_p7 = scmp.lt.s32.totalorder %s506_s8, %s777_s26  ;;  %p780_p8 = scmp.lt.s32.totalorder %s778_s23, %s772_s11 }
  0x43   : > { %p775_p5 = pneg %p774_p4 }
  0x44   : > { %p781_p10 = por %p780_p8, %p779_p7 }
  0x46   : > { %p782_p0 = pnand %p781_p10, %p775_p5 }
 0x101   : > { %v304_v6 = vpop.f32.mrf.mxu0 }
 0x102   : > { %v647_v7 = vpack.c.bf16 %v304_v6, %v304_v6 }
 0x103   : > { %v665_v8 = vpop.f32.mrf.mxu0 }
 0x104   : > { %452 = vst.msk [vmem:[%s1019_s29] sm:$0xf] %vm451_vm2, %v647_v7 }
 0x105   : > { %v307_v9 = vpop.f32.mrf.mxu0 }
 0x106   : > { %v311_v10 = vpack.c.bf16 %v307_v9, %v304_v6  ;;  %v648_v11 = vpack.c.bf16 %v307_v9, %v307_v9 }
 0x107   : > { %v666_v12 = vpop.f32.mrf.mxu0 }
 0x108   : > { %453 = vst.msk [vmem:[%s1019_s29 + $0x4] sm:$0xf] %vm451_vm2, %v648_v11  ;;  %v317_v13 = vsel %vm312_vm3, %v311_v10, 0 }
 0x109   : > { %668 = vmatpush3.bf16.xpose.msra.mxu1 %v317_v13 }
 0x110   : > { %670 = vmatmul.mubr.msk.bf16.vlgmr.msra.gmra.mxu1 %vm312_vm3, %v253_v15 }
 0x1d0   : > { %v353_v17 = vpop.f32.mrf.mxu1 }
 0x1d1   : > { %v359_v18 = vmul.f32 0.14285715, %v353_v17 }
 0x1d2   : > { %v671_v19 = vpop.f32.mrf.mxu1 }
 0x1d3   : > { %v360_v20 = vsel %vm312_vm3, %v359_v18, -inf }
 0x1d4   : > { %v361_v21 = vrot.slane %v360_v20, 4  ;;  %v356_v22 = vpop.f32.mrf.mxu1 }
 0x1d6   : > { %v362_v23 = vmax.f32 %v360_v20, %v361_v21  ;;  %v672_v24 = vpop.f32.mrf.mxu1 }
 0x1d8   : > { %v363_v25 = vrot.slane %v362_v23, 2 }
 0x1da   : > { %v364_v26 = vmax.f32 %v362_v23, %v363_v25 }
 0x1dc   : > { %v365_v27 = vrot.slane %v364_v26, 1 }
 0x1de   : > { %v366_v28 = vmax.f32 %v364_v26, %v365_v27 }
 0x1e0   : > { %v367_v29 = vsub.f32 %v359_v18, %v366_v28 }
 0x1e2   : > { %v368_v30 = vmul.f32 1.442695, %v367_v29 }
 0x1e4   : > { %740 = vpow2.f32 %v368_v30 }
 0x1f1   : > { %v741_v31 = vpop.eup %740 }
 0x1f2   : > { %v370_v32 = vsel %vm312_vm3, %v741_v31, 0.0 }
 0x1f3   : > { %v371_v33 = vrot.slane %v370_v32, 4 }
 0x1f5   : > { %v372_v34 = vadd.f32 %v371_v33, %v370_v32 }
 0x1f7   : > { %v373_v35 = vrot.slane %v372_v34, 2 }
 0x1f9   : > { %v374_v36 = vadd.f32 %v373_v35, %v372_v34 }
 0x1fb   : > { %v375_v37 = vrot.slane %v374_v36, 1 }
 0x1fd   : > { %v376_v38 = vadd.f32 %v375_v37, %v374_v36 }
 0x1ff   : > { %742 = vrcp.f32 %v376_v38 }
 0x20c   : > { %v743_v39 = vpop.eup %742 }
 0x20d   : > { %v378_v40 = vmul.f32 %v743_v39, %v741_v31 }
 0x20f   : > { %v379_v41 = vpack.c.bf16 %v378_v40, %v378_v40  ;;  %469 = vst.msk [vmem:[%s239_s7] sm:$0xff] %vm312_vm3, %v378_v40 }
 0x211   : > { %380 = vxpose.xlu0.c.b16.start.end [1/1] (short) (narrow) %v379_v41, 16 }
 0x273   : > { %v388_v42 = vpop.trf.xlu0 }
 0x274   : > { %676 = vmatmul.mubr.msk.bf16.vlgmr.msra.gmra.mxu0 %vm396_vm5, %v388_v42 }
 0x275   : > { %785 = shalt.err (!%p782_p0)
}
 0x276   : > { %s786_s25 = scalar_lea.hbm %s503_s22, 128  ;;  %s790_s6 = scalar_lea.hbm %s1109_s4, 256 }
 0x277   : > { %p787_p2 = scmp.ne.s32.totalorder %s503_s22, %s786_s25  ;;  %p791_p3 = scmp.lt.s32.totalorder %s503_s22, %s1109_s4 }
 0x278   : > { %p792_p6 = scmp.lt.s32.totalorder %s790_s6, %s786_s25 }
 0x279   : > { %p788_p9 = pnand %p787_p2, %p1118_p13 }
 0x27a   : > { %p793_p11 = por %p792_p6, %p791_p3 }
 0x27b   : > { %p789_p1 = pneg %p788_p9 }
 0x27d   : > { %p794_p12 = pnand %p793_p11, %p789_p1 }
 0x27f   : > { %797 = shalt.err (!%p794_p12)
}
 0x280   : > { %682 = dma.vmem_to_hbm [thread:$0]  (%p1118_p13), %s506_s8, 128, %s503_s22, %s476_s10   ;;  %vm466_vm6 = vcmask 257152  }
 0x281   : > { %s874_s20 = smov 16   ;;  %s489_s11 = sshll.u32 %s1019_s29, 4  ;;  %s1061_s11 = int_to_ptr.vmem [resolvable:$true] %s489_s11 }
 0x282   : > { %s1059_s22 = scalar_lea.hbm %s1108_s3, %s651_s9  ;;  %s471_s8 = scalar_lea.sflag [#allocation4], %s1000_s13 }
 0x283   : > { %s798_s10 = scalar_lea.vmem %s1061_s11, 128  ;;  %s875_s23 = smov [#allocation5]  }
 0x284   : > { %p799_p4 = scmp.ne.s32.totalorder %s1061_s11, %s798_s10  ;;  %s802_s19 = sshll.u32 %s875_s23, 4  ;;  %s803_s19 = int_to_ptr.vmem [resolvable:$false] %s802_s19 }
 0x285   : > { %s804_s25 = scalar_lea.vmem %s803_s19, 256  ;;  %p805_p8 = scmp.lt.s32.totalorder %s1061_s11, %s803_s19 }
 0x286   : > { %p800_p5 = pnand %p799_p4, %p1118_p13  ;;  %p806_p10 = scmp.lt.s32.totalorder %s804_s25, %s798_s10 }
 0x288   : > { %p801_p7 = pneg %p800_p5  ;;  %p807_p0 = por %p806_p10, %p805_p8 }
 0x28a   : > { %p808_p2 = pnand %p807_p0, %p801_p7 }
 0x334   : > { %v437_v43 = vpop.f32.mrf.mxu0 }
 0x335   : > { %v649_v44 = vpack.c.bf16 %v437_v43, %v437_v43 }
 0x336   : > { %v677_v45 = vpop.f32.mrf.mxu0 }
 0x337   : > { %460 = vrot.lane.b32.xlu0 %v649_v44, %s874_s20 }
 0x338   : > { %v440_v46 = vpop.f32.mrf.mxu0 }
 0x339   : > { %v650_v47 = vpack.c.bf16 %v440_v46, %v440_v46 }
 0x33a   : > { %v678_v48 = vpop.f32.mrf.mxu0 }
 0x33b   : > { %462 = vrot.lane.b32.xlu1 %v650_v47, %s874_s20 }
 0x3a9   : > { %v461_v49 = vpop.permute.xlu0 %460 }
 0x3aa   : > { %467 = vst.msk [vmem:[%s1019_s29] sm:$0xf] %vm466_vm6, %v461_v49 }
 0x3ad   : > { %v463_v50 = vpop.permute.xlu1 %462 }
 0x3ae   : > { %468 = vst.msk [vmem:[%s1019_s29 + $0x4] sm:$0xf] %vm466_vm6, %v463_v50 }
 0x3af   : > { %811 = shalt.err (!%p808_p2)
}
 0x3b0   : > { %s812_s29 = scalar_lea.hbm %s1059_s22, 128  ;;  %s816_s5 = scalar_lea.hbm %s1108_s3, 256 }
 0x3b1   : > { %p813_p9 = scmp.ne.s32.totalorder %s1059_s22, %s812_s29  ;;  %p817_p6 = scmp.lt.s32.totalorder %s1059_s22, %s1108_s3 }
 0x3b2   : > { %p818_p11 = scmp.lt.s32.totalorder %s816_s5, %s812_s29 }
 0x3b3   : > { %p814_p1 = pnand %p813_p9, %p1118_p13 }
 0x3b4   : > { %p819_p12 = por %p818_p11, %p817_p6 }
 0x3b5   : > { %p815_p3 = pneg %p814_p1 }
 0x3b7   : > { %p820_p4 = pnand %p819_p12, %p815_p3 }
 0x3b9   : > { %823 = shalt.err (!%p820_p4)
}
 0x3ba   : > { %s876_s14 = smov 64   ;;  %s877_s20 = smov 4  }
 0x3bb   : > { %681 = dma.vmem_to_hbm [thread:$0]  (%p1118_p13), %s1061_s11, 128, %s1059_s22, %s471_s8, %s876_s14, %s876_s14, %s877_s20  }
 0x3bc PF: > { %s517_s12 = sand.u32 1, %s854_s15   ;;  %p1119_p5 = scmp.ne.s32.totalorder %s1115_s28, 0 }
 0x3bd   : > { %p1120_p7 = scmp.ge.s32.totalorder %s866_s18, 2  ;;  %s518_s26 = scalar_lea.sflag [#allocation4], %s517_s12 }
 0x3bf   : > { %p690_p8 = pnand %p1120_p7, %p1119_p5 }
 0x3c1   : > { %p691_p10 = pneg %p690_p8 }
 0x3c3   : > { %845 = dma.done.wait (%p691_p10), %s518_s26, 128  }
 0x3c4   : > { %847 = vsyncadd (%p691_p10), %s518_s26, 4294967168  ;;  %s527_s10 = scalar_lea.sflag [#allocation7], %s517_s12 }
 0x3c5   : > { %849 = dma.done.wait (%p691_p10), %s527_s10, 128  }
 0x3c6   : > { %851 = vsyncadd (%p691_p10), %s527_s10, 4294967168  ;;  %p21_p13 = scmp.ge.s32.totalorder %s928_s21, 4   ;;  %s1121_s15 = smov %s858_s16 }
 0x3c7   : > { %s1122_s16 = smov %s862_s17  ;;  %s1123_s17 = smov %s940_s24 }
 0x3c8   : > { %s1124_s18 = smov %s928_s21  ;;  %23 = sbr.rel (!%p21_p13) target bundleno = 7 (0x7), region = 97 }
 0x3cd   :  { %532 = vsyncpa [#allocation3], 1 }
 0x3ce   :  { %534 = vsyncpa [#allocation3 + $0x1], 1 }
 0x3cf   :  { %535 = vsyncpa [#allocation4], 1 }
 0x3d0   :  { %537 = vsyncpa [#allocation4 + $0x1], 1 }
 0x3d1   :  { %538 = vsyncpa [#allocation7], 1 }
 0x3d2   :  { %540 = vsyncpa [#allocation7 + $0x1], 1 }

</bundles_post_ra>
